<compile_context>
chip_gen: v5e
topology: v5e:2x2
jax: 0.10.0
libtpu: 0.0.40
codegen_flags: <defaults>
</compile_context>

<pallas_src>
import functools

import jax
import jax.numpy as jnp
from jax import lax
from jax.experimental import pallas as pl
from jax.experimental.pallas import tpu as pltpu

_LANE = 128      # vreg lane width
_SUBLANE = 8     # vreg sublane count (f32)


def _round_up(v, m):
    return ((v + m - 1) // m) * m


def mlp_kernel(x_ref, w1_ref, b1_ref, w2t_ref, b2t_ref, ot_ref):
    # Cast x inside the kernel (avoids an extra wrapper-side XLA pass over x).
    x = x_ref[...].astype(w1_ref.dtype)
    # fc1: (tb, D_in) @ (D_in, H), f32 accumulation; bias-add + ReLU in f32.
    h = jnp.dot(x, w1_ref[...], preferred_element_type=jnp.float32)
    h = jnp.maximum(h + b1_ref[...], 0.0)
    # fc2, transposed: (d_pad, H) . (tb, H) contracting on H -> (d_pad, tb),
    # so the batch occupies the lane axis and stores are lane-dense even
    # though the real output width is only 2.
    out_t = lax.dot_general(
        w2t_ref[...], h.astype(w2t_ref.dtype),
        dimension_numbers=(((1,), (1,)), ((), ())),
        preferred_element_type=jnp.float32)
    ot_ref[...] = (out_t + b2t_ref[...]).astype(ot_ref.dtype)


def prepare_params(w1, b1, w2, b2, *, compute_dtype=jnp.float32):
    """One-time parameter prep (hoisted out of the per-call forward path).

    w1: (D_in, H), b1: (H,)  -- fc1 as x @ w1 + b1
    w2: (H, D_out), b2: (D_out,)
    fc2 is stored transposed and zero-padded to 8 sublanes so the kernel's
    output slab is (8, B) with the batch on the lane axis.
    bf16 compute_dtype is valid on v5e/v6e/v7x (MXU is bf16-native on all).
    """
    D_in, H = w1.shape
    D_out = w2.shape[1]
    d_pad = _round_up(D_out, _SUBLANE)
    w1c = jnp.asarray(w1).astype(compute_dtype)
    b1c = jnp.asarray(b1, jnp.float32).reshape(1, H)
    w2t = jnp.zeros((d_pad, H), compute_dtype).at[:D_out, :].set(
        jnp.asarray(w2).T.astype(compute_dtype))
    b2t = jnp.zeros((d_pad, 1), jnp.float32).at[:D_out, 0].set(
        jnp.asarray(b2, jnp.float32).reshape(-1))
    return w1c, b1c, w2t, b2t, D_out


@functools.partial(jax.jit, static_argnames=("d_out", "tile_b"))
def mlp_forward(x, w1c, b1c, w2t, b2t, *, d_out, tile_b=4096):
    B, D_in = x.shape
    H = w1c.shape[1]
    d_pad = w2t.shape[0]

    # Batch tile: multiple of 128 so the transposed (d_pad, tb) output block is
    # lane-dense.  No wrapper pad of x: Pallas handles the ragged last block
    # (OOB input rows are garbage but purely row-wise -> masked OOB output
    # lanes are never written back).
    tb = min(_round_up(int(tile_b), _LANE), _round_up(B, _LANE))
    n_tiles = pl.cdiv(B, tb)
    # Best-effort: even tile count >= 2 so the "parallel" batch axis balances
    # across v7x's two TensorCores (no effect on single-core v5e/v6e).
    if n_tiles > 1 and n_tiles % 2 == 1:
        tb2 = _round_up(pl.cdiv(B, n_tiles + 1), _LANE)
        if tb2 >= _LANE:
            tb = tb2
            n_tiles = pl.cdiv(B, tb)
    grid = (n_tiles,)

    # Explicit scoped-VMEM budget (double-buffered x/out tiles + resident
    # weights + f32 intermediates) with 2x headroom; keeps v5e (16 MiB default)
    # behaving like v6e/v7x while staying well under v7x's 64 MiB physical.
    est = (2 * tb * D_in * 4            # x tiles (double-buffered, <=4B/elt)
           + 2 * d_pad * tb * 4         # output tiles
           + 2 * tb * H * 4             # hidden activations (f32)
           + 2 * (D_in * H + H + d_pad * H + d_pad) * 4)   # resident weights
    vmem_limit = int(min(max(2 * est + (1 << 20), 16 << 20), 48 << 20))

    out_t = pl.pallas_call(
        mlp_kernel,
        out_shape=jax.ShapeDtypeStruct((d_pad, B), jnp.float32),
        grid_spec=pl.GridSpec(
            grid=grid,
            in_specs=[
                pl.BlockSpec((tb, D_in), lambda i: (i, 0)),   # batch-tiled x
                pl.BlockSpec((D_in, H), lambda i: (0, 0)),    # resident weights
                pl.BlockSpec((1, H), lambda i: (0, 0)),
                pl.BlockSpec((d_pad, H), lambda i: (0, 0)),
                pl.BlockSpec((d_pad, 1), lambda i: (0, 0)),
            ],
            out_specs=pl.BlockSpec((d_pad, tb), lambda i: (0, i)),
        ),
        compiler_params=pltpu.CompilerParams(
            dimension_semantics=("parallel",),   # megacore sharding on v7x
            vmem_limit_bytes=vmem_limit,
        ),
    )(x, w1c, b1c, w2t, b2t)

    # (d_pad, B) -> (B, d_out).  The slab is only 8 x B f32, so this slice +
    # transpose is negligible (unlike the old 128-wide padded output).
    return out_t[:d_out, :].T


if __name__ == "__main__":
    # Shapes implied by the module: input_size features -> hidden 64 -> output 2.
    batch = 8
    input_size = 32
    hidden_size = 64
    output_size = 2

    key = jax.random.PRNGKey(0)
    kx, k1, kb1, k2, kb2 = jax.random.split(key, 5)

    x = jax.random.normal(kx, (batch, input_size), dtype=jnp.float32)
    # Deterministic PyTorch-like uniform init, stored as (in, out) so the
    # kernel computes x @ W + b directly (same math as nn.Linear).
    lim1 = 1.0 / jnp.sqrt(input_size)
    w1 = jax.random.uniform(k1, (input_size, hidden_size), jnp.float32, -lim1, lim1)
    b1 = jax.random.uniform(kb1, (hidden_size,), jnp.float32, -lim1, lim1)
    lim2 = 1.0 / jnp.sqrt(hidden_size)
    w2 = jax.random.uniform(k2, (hidden_size, output_size), jnp.float32, -lim2, lim2)
    b2 = jax.random.uniform(kb2, (output_size,), jnp.float32, -lim2, lim2)

    # Pure-JAX reference.
    ref = jnp.maximum(x @ w1 + b1[None, :], 0.0) @ w2 + b2[None, :]

    # f32 path (tight tolerance).  Weight prep happens once, outside forward.
    w1c, b1c, w2t, b2t, d_out = prepare_params(w1, b1, w2, b2)
    out = jax.block_until_ready(mlp_forward(x, w1c, b1c, w2t, b2t, d_out=d_out))
    assert out.shape == (batch, output_size)
    assert jnp.allclose(out, ref, atol=1e-5, rtol=1e-5)

    # Larger non-tile-multiple batch: exercises multi-tile grid + ragged last block.
    big = 1000
    xb = jax.random.normal(kx, (big, input_size), dtype=jnp.float32)
    refb = jnp.maximum(xb @ w1 + b1[None, :], 0.0) @ w2 + b2[None, :]
    outb = jax.block_until_ready(
        mlp_forward(xb, w1c, b1c, w2t, b2t, d_out=d_out, tile_b=256))
    assert outb.shape == (big, output_size)
    assert jnp.allclose(outb, refb, atol=1e-5, rtol=1e-5)

    # bf16 MXU feed (v5e/v6e/v7x); x stays f32 and is cast inside the kernel.
    w1b, b1b, w2tb, b2tb, d_out_b = prepare_params(
        w1, b1, w2, b2, compute_dtype=jnp.bfloat16)
    outbf = jax.block_until_ready(
        mlp_forward(x, w1b, b1b, w2tb, b2tb, d_out=d_out_b))
    assert outbf.shape == (batch, output_size)
    assert jnp.allclose(outbf, ref, atol=5e-2, rtol=5e-2)

    print("KERNEL_OK")
</pallas_src>

<mosaic_0001>
module attributes {stable_mosaic.version = 11 : i64} {
  func.func @mlp_kernel(%arg0: i32, %arg1: memref<128x32xf32, #tpu.memory_space<vmem>>, %arg2: memref<32x64xf32, #tpu.memory_space<vmem>>, %arg3: memref<1x64xf32, #tpu.memory_space<vmem>>, %arg4: memref<8x64xf32, #tpu.memory_space<vmem>>, %arg5: memref<8x1xf32, #tpu.memory_space<vmem>>, %arg6: memref<8x128xf32, #tpu.memory_space<vmem>>) attributes {dimension_semantics = [#tpu.dimension_semantics<parallel>], iteration_bounds = array<i64: 1>, scalar_prefetch = 0 : i64, scratch_operands = 0 : i64, tpu.core_type = #tpu.core_type<tc>, window_params = [{transform_indices = @transform_0, window_bounds = array<i64: 128, 32>}, {pipeline_mode = #tpu.pipeline_mode<synchronous>, transform_indices = @transform_1, window_bounds = array<i64: 32, 64>}, {pipeline_mode = #tpu.pipeline_mode<synchronous>, transform_indices = @transform_2, window_bounds = array<i64: 1, 64>}, {pipeline_mode = #tpu.pipeline_mode<synchronous>, transform_indices = @transform_3, window_bounds = array<i64: 8, 64>}, {pipeline_mode = #tpu.pipeline_mode<synchronous>, transform_indices = @transform_4, window_bounds = array<i64: 8, 1>}, {transform_indices = @transform_5, window_bounds = array<i64: 8, 128>}]} {
    %c0 = arith.constant 0 : index
    %c0_0 = arith.constant 0 : index
    %0 = vector.load %arg1[%c0, %c0_0] : memref<128x32xf32, #tpu.memory_space<vmem>>, vector<128x32xf32>
    %c0_1 = arith.constant 0 : index
    %c0_2 = arith.constant 0 : index
    %1 = vector.load %arg2[%c0_1, %c0_2] : memref<32x64xf32, #tpu.memory_space<vmem>>, vector<32x64xf32>
    %cst = arith.constant dense<0.000000e+00> : vector<128x64xf32>
    %2 = tpu.matmul %0, %1, %cst {dimension_numbers = #tpu.dot_dimension_numbers<[1], [0], [0], [1], [0, 0, 1, 1], [], []>} : vector<128x32xf32>, vector<32x64xf32>, vector<128x64xf32> -> vector<128x64xf32>
    %c0_3 = arith.constant 0 : index
    %c0_4 = arith.constant 0 : index
    %3 = vector.load %arg3[%c0_3, %c0_4] : memref<1x64xf32, #tpu.memory_space<vmem>>, vector<1x64xf32>
    %4 = vector.broadcast %3 : vector<1x64xf32> to vector<128x64xf32>
    %5 = arith.addf %2, %4 : vector<128x64xf32>
    %cst_5 = arith.constant 0.000000e+00 : f32
    %6 = vector.broadcast %cst_5 : f32 to vector<128x64xf32>
    %7 = arith.maximumf %5, %6 : vector<128x64xf32>
    %c0_6 = arith.constant 0 : index
    %c0_7 = arith.constant 0 : index
    %8 = vector.load %arg4[%c0_6, %c0_7] : memref<8x64xf32, #tpu.memory_space<vmem>>, vector<8x64xf32>
    %cst_8 = arith.constant dense<0.000000e+00> : vector<8x128xf32>
    %9 = tpu.matmul %8, %7, %cst_8 {dimension_numbers = #tpu.dot_dimension_numbers<[1], [1], [0], [0], [0, 0, 1, 0], [], []>} : vector<8x64xf32>, vector<128x64xf32>, vector<8x128xf32> -> vector<8x128xf32>
    %c0_9 = arith.constant 0 : index
    %c0_10 = arith.constant 0 : index
    %10 = vector.load %arg5[%c0_9, %c0_10] : memref<8x1xf32, #tpu.memory_space<vmem>>, vector<8x1xf32>
    %11 = vector.broadcast %10 : vector<8x1xf32> to vector<8x128xf32>
    %12 = arith.addf %9, %11 : vector<8x128xf32>
    %c0_11 = arith.constant 0 : index
    %c0_12 = arith.constant 0 : index
    %13 = vector.load %arg6[%c0_11, %c0_12] : memref<8x128xf32, #tpu.memory_space<vmem>>, vector<8x128xf32>
    tpu.vector_store %arg6[%c0_11, %c0_12], %12 {strides = array<i32>} : memref<8x128xf32, #tpu.memory_space<vmem>>, vector<8x128xf32>,
    return
  }
  func.func @transform_0(%arg0: i32) -> (i32, i32) {
    %c0_i32 = arith.constant 0 : i32
    %c0_i32_0 = arith.constant 0 : i32
    return %arg0, %c0_i32 : i32, i32
  }
  func.func @transform_1(%arg0: i32) -> (i32, i32) {
    %c0_i32 = arith.constant 0 : i32
    %c0_i32_0 = arith.constant 0 : i32
    %c0_i32_1 = arith.constant 0 : i32
    return %c0_i32, %c0_i32_0 : i32, i32
  }
  func.func @transform_2(%arg0: i32) -> (i32, i32) {
    %c0_i32 = arith.constant 0 : i32
    %c0_i32_0 = arith.constant 0 : i32
    %c0_i32_1 = arith.constant 0 : i32
    return %c0_i32, %c0_i32_0 : i32, i32
  }
  func.func @transform_3(%arg0: i32) -> (i32, i32) {
    %c0_i32 = arith.constant 0 : i32
    %c0_i32_0 = arith.constant 0 : i32
    %c0_i32_1 = arith.constant 0 : i32
    return %c0_i32, %c0_i32_0 : i32, i32
  }
  func.func @transform_4(%arg0: i32) -> (i32, i32) {
    %c0_i32 = arith.constant 0 : i32
    %c0_i32_0 = arith.constant 0 : i32
    %c0_i32_1 = arith.constant 0 : i32
    return %c0_i32, %c0_i32_0 : i32, i32
  }
  func.func @transform_5(%arg0: i32) -> (i32, i32) {
    %c0_i32 = arith.constant 0 : i32
    %c0_i32_0 = arith.constant 0 : i32
    return %c0_i32, %arg0 : i32, i32
  }
}

</mosaic_0001>

<bundles_post_ra>
// kernel: mlp_forward.1
= control target key start
LH: loop header
LB: loop body
LE: loop exit
PB: predicated region body
PF: predicated region fallthrough
CT: control target
= control target key end

     0   :  { %10 = vsyncpa [#allocation3], 0  ;;  %s524_s0 = inlined_call_operand.vmem [shape: f32[8,32], index: 0, kind: input, shape index: {}]   ;;  %s525_s1 = inlined_call_operand.hbm [shape: f32[32,64], index: 1, kind: input, shape index: {}]   ;;  %s526_s2 = inlined_call_operand.vmem [shape: f32[1,64], index: 2, kind: input, shape index: {}]   ;;  %s527_s3 = inlined_call_operand.hbm [shape: f32[8,64], index: 3, kind: input, shape index: {}]   ;;  %s528_s4 = inlined_call_operand.vmem [shape: f32[8,1], index: 4, kind: input, shape index: {}]   ;;  %s529_s5 = inlined_call_operand.vmem [shape: f32[8,8], index: 5, kind: output, shape index: {}]  }
   0x1   :  { %s18_s20 = sshll.u32 %s525_s1, 4  ;;  %s19_s20 = int_to_ptr.hbm [resolvable:$true] %s18_s20 }
   0x2   :  { %11 = vsyncpa [#allocation5], 0  ;;  %s390_s21 = smov [#allocation2]   ;;  %s34_s25 = sshll.u32 %s527_s3, 4  ;;  %s35_s25 = int_to_ptr.hbm [resolvable:$true] %s34_s25 }
   0x3   :  { %s20_s22 = sshll.u32 %s390_s21, 4  ;;  %s391_s26 = smov 128   ;;  %s21_s22 = int_to_ptr.vmem [resolvable:$true] %s20_s22 }
   0x4   :  { %s392_s27 = smov 8   ;;  %s393_s28 = smov [#allocation4]  }
   0x5   :  { %26 = dma.hbm_to_vmem [thread:$0]  %s19_s20, 512, %s21_s22, [#allocation3], %s391_s26, %s391_s26, %s392_s27  }
   0x6   :  { %s36_s29 = sshll.u32 %s393_s28, 4  ;;  %s37_s29 = int_to_ptr.vmem [resolvable:$true] %s36_s29 }
   0x7   :  { %39 = dma.hbm_to_vmem [thread:$0]  %s35_s25, 128, %s37_s29, [#allocation5]  }
   0x8   :  { %386 = dma.done.wait [#allocation3], 512  }
   0x9   :  { %387 = vsyncadd [#allocation3], 4294966784 }
   0xa   :  { %388 = dma.done.wait [#allocation5], 128  }
   0xb   :  { %389 = vsyncadd [#allocation5], 4294967168  ;;  %v69_v0 = vld [vmem:[#allocation2 + $0x18] sm:$0xff]  ;;  %v68_v1 = vld [vmem:[#allocation2 + $0x10] sm:$0xff]  ;;  %vm74_vm0 = vcmask 261120   ;;  %vm211_vm1 = vcmask 523264  }
   0xc   :  { %323 = vmatpush.msra.mxu2 %v69_v0  ;;  %324 = vmatpush.msra.mxu3 %v69_v0  ;;  %v67_v2 = vld [vmem:[#allocation2 + $0x8] sm:$0xff]  ;;  %v66_v3 = vld [vmem:[#allocation2] sm:$0xff]  ;;  %v56_v4 = vld [vmem:[%s524_s0 + $0x30] sm:$0xff]  ;;  %v394_v58 = vmov 0  }
   0xd   :  { %135 = vmatpush.msra.mxu0 %v69_v0  ;;  %v62_v5 = vld [vmem:[%s524_s0 + $0x60] sm:$0xff]  ;;  %v57_v7 = vld [vmem:[%s524_s0 + $0x38] sm:$0xff]  ;;  %v63_v8 = vld [vmem:[%s524_s0 + $0x68] sm:$0xff]  ;;  %336 = vset.pattern.permute.xlu0 %v394_v58 }
   0xe   :  { %325 = vmatpush.msra.mxu2 %v68_v1  ;;  %326 = vmatpush.msra.mxu3 %v68_v1  ;;  %v50_v6 = vld [vmem:[%s524_s0] sm:$0xff]  ;;  %v51_v9 = vld [vmem:[%s524_s0 + $0x8] sm:$0xff]  ;;  %v64_v11 = vld [vmem:[%s524_s0 + $0x70] sm:$0xff] }
   0xf   :  { %136 = vmatpush.msra.mxu0 %v68_v1  ;;  %v58_v10 = vld [vmem:[%s524_s0 + $0x40] sm:$0xff]  ;;  %v52_v12 = vld [vmem:[%s524_s0 + $0x10] sm:$0xff]  ;;  %v59_v13 = vld [vmem:[%s524_s0 + $0x48] sm:$0xff] }
  0x10   :  { %327 = vmatpush.msra.mxu2 %v67_v2  ;;  %328 = vmatpush.msra.mxu3 %v67_v2  ;;  %v65_v14 = vld [vmem:[%s524_s0 + $0x78] sm:$0xff]  ;;  %v60_v16 = vld [vmem:[%s524_s0 + $0x50] sm:$0xff]  ;;  %v54_v17 = vld [vmem:[%s524_s0 + $0x20] sm:$0xff] }
  0x11   :  { %137 = vmatpush.msra.mxu0 %v67_v2  ;;  %v53_v15 = vld [vmem:[%s524_s0 + $0x18] sm:$0xff]  ;;  %v55_v19 = vld [vmem:[%s524_s0 + $0x28] sm:$0xff]  ;;  %v337_v28 = vld [vmem:[%s526_s2] ss:$0 sm:$0xff] }
  0x12   :  { %329 = vmatpush.msra.mxu2 %v66_v3  ;;  %330 = vmatpush.msra.mxu3 %v66_v3  ;;  %v61_v18 = vld [vmem:[%s524_s0 + $0x58] sm:$0xff]  ;;  %v205_v56 = vld [vmem:[%s528_s4] sm:$0xff] }
  0x13   :  { %296 = vmatmul.msk.f32.vlgmr.msra.gmra.mxu2 %vm74_vm0, %v56_v4  ;;  %302 = vmatmul.msk.f32.vlgmr.msra.gmra.mxu3 %vm74_vm0, %v62_v5 }
  0x14   :  { %138 = vmatpush.msra.mxu0 %v66_v3  ;;  %208 = vperm.xlu0 %336, %v205_v56  }
  0x15   :  { %290 = vmatmul.msk.f32.vlgmr.msra.gmra.mxu0 %vm74_vm0, %v50_v6 }
  0x1b   :  { %297 = vmatmul.msk.f32.gmra.mxu2 %vm74_vm0, %v57_v7  ;;  %303 = vmatmul.msk.f32.gmra.mxu3 %vm74_vm0, %v63_v8  ;;  %v204_v7 = vld [vmem:[#allocation4] sm:$0xff] }
  0x1d   :  { %291 = vmatmul.msk.f32.gmra.mxu0 %vm74_vm0, %v51_v9 }
  0x23   :  { %298 = vmatmul.msk.f32.gmra.mxu2 %vm74_vm0, %v58_v10  ;;  %304 = vmatmul.msk.f32.gmra.mxu3 %vm74_vm0, %v64_v11 }
  0x25   :  { %292 = vmatmul.msk.f32.gmra.mxu0 %vm74_vm0, %v52_v12 }
  0x2b   :  { %299 = vmatmul.msk.f32.gmra.mxu2 %vm74_vm0, %v59_v13  ;;  %305 = vmatmul.msk.f32.gmra.mxu3 %vm74_vm0, %v65_v14 }
  0x2d   :  { %293 = vmatmul.msk.f32.gmra.mxu0 %vm74_vm0, %v53_v15 }
  0x33   :  { %300 = vmatmul.msk.f32.gmra.mxu2 %vm74_vm0, %v60_v16 }
  0x35   :  { %294 = vmatmul.msk.f32.gmra.mxu0 %vm74_vm0, %v54_v17 }
  0x3b   :  { %301 = vmatmul.msk.f32.gmra.mxu2 %vm74_vm0, %v61_v18 }
  0x3d   :  { %295 = vmatmul.msk.f32.gmra.mxu0 %vm74_vm0, %v55_v19 }
  0x86   :  { %v209_v8 = vpop.permute.xlu0 %208 }
  0x92   :  { %v495_v22 = vpop.f32.mrf.mxu0 }
  0x93   :  { %v141_v4 = vadd.f32 %v337_v28, %v495_v22 }
  0x95   :  { %v188_v6 = vmax.f32 %v141_v4, 0.0 }
  0x96   :  { %v158_v20 = vpop.f32.mrf.mxu2  ;;  %v176_v21 = vpop.f32.mrf.mxu3 }
  0x97   :  { %v177_v38 = vadd.f32 %v337_v28, %v176_v21  ;;  %v159_v54 = vadd.f32 %v337_v28, %v158_v20 }
  0x99   :  { %v200_v41 = vmax.f32 %v177_v38, 0.0  ;;  %v194_v59 = vmax.f32 %v159_v54, 0.0 }
  0x9a   :  { %v143_v27 = vpop.f32.mrf.mxu0 }
  0x9b   :  { %v144_v2 = vadd.f32 %v337_v28, %v143_v27 }
  0x9d   :  { %v189_v5 = vmax.f32 %v144_v2, 0.0 }
  0x9e   :  { %v161_v23 = vpop.f32.mrf.mxu2  ;;  %v179_v24 = vpop.f32.mrf.mxu3 }
  0x9f   :  { %v180_v35 = vadd.f32 %v337_v28, %v179_v24  ;;  %v162_v51 = vadd.f32 %v337_v28, %v161_v23 }
  0xa1   :  { %v201_v39 = vmax.f32 %v180_v35, 0.0  ;;  %v195_v55 = vmax.f32 %v162_v51, 0.0 }
  0xa2   :  { %v146_v34 = vpop.f32.mrf.mxu0 }
  0xa3   :  { %v147_v0 = vadd.f32 %v337_v28, %v146_v34 }
  0xa5   :  { %v190_v3 = vmax.f32 %v147_v0, 0.0 }
  0xa6   :  { %v164_v25 = vpop.f32.mrf.mxu2  ;;  %v182_v26 = vpop.f32.mrf.mxu3 }
  0xa7   :  { %v183_v32 = vadd.f32 %v337_v28, %v182_v26  ;;  %v165_v49 = vadd.f32 %v337_v28, %v164_v25 }
  0xa9   :  { %v202_v36 = vmax.f32 %v183_v32, 0.0  ;;  %v196_v52 = vmax.f32 %v165_v49, 0.0 }
  0xaa   :  { %v149_v40 = vpop.f32.mrf.mxu0 }
  0xab   :  { %v150_v62 = vadd.f32 %v337_v28, %v149_v40 }
  0xad   :  { %v191_v1 = vmax.f32 %v150_v62, 0.0 }
  0xae   :  { %v167_v29 = vpop.f32.mrf.mxu2  ;;  %v185_v30 = vpop.f32.mrf.mxu3 }
  0xaf   :  { %v186_v31 = vadd.f32 %v337_v28, %v185_v30  ;;  %v168_v46 = vadd.f32 %v337_v28, %v167_v29 }
  0xb1   :  { %v203_v33 = vmax.f32 %v186_v31, 0.0  ;;  %v197_v50 = vmax.f32 %v168_v46, 0.0 }
  0xb2   :  { %v152_v48 = vpop.f32.mrf.mxu0 }
  0xb3   :  { %306 = vmatpush.xpose.msk.msra.mxu1 %vm211_vm1, %v203_v33  ;;  %v153_v61 = vadd.f32 %v337_v28, %v152_v48 }
  0xb5   :  { %v192_v63 = vmax.f32 %v153_v61, 0.0 }
  0xb6   :  { %v170_v37 = vpop.f32.mrf.mxu2 }
  0xb7   :  { %307 = vmatpush.xpose.msk.msra.mxu1 %vm211_vm1, %v202_v36  ;;  %v171_v44 = vadd.f32 %v337_v28, %v170_v37 }
  0xb9   :  { %v198_v47 = vmax.f32 %v171_v44, 0.0 }
  0xba   :  { %v155_v53 = vpop.f32.mrf.mxu0 }
  0xbb   :  { %308 = vmatpush.xpose.msk.msra.mxu1 %vm211_vm1, %v201_v39  ;;  %v156_v57 = vadd.f32 %v337_v28, %v155_v53 }
  0xbd   :  { %v193_v60 = vmax.f32 %v156_v57, 0.0 }
  0xbe   :  { %v173_v42 = vpop.f32.mrf.mxu2 }
  0xbf   :  { %v174_v43 = vadd.f32 %v337_v28, %v173_v42  ;;  %309 = vmatpush.xpose.msk.msra.mxu1 %vm211_vm1, %v200_v41 }
  0xc1   :  { %v199_v45 = vmax.f32 %v174_v43, 0.0 }
  0xc3   :  { %310 = vmatpush.xpose.msk.msra.mxu1 %vm211_vm1, %v199_v45 }
  0xc7   :  { %311 = vmatpush.xpose.msk.msra.mxu1 %vm211_vm1, %v198_v47 }
  0xcb   :  { %312 = vmatpush.xpose.msk.msra.mxu1 %vm211_vm1, %v197_v50 }
  0xcf   :  { %313 = vmatpush.xpose.msk.msra.mxu1 %vm211_vm1, %v196_v52 }
  0xd3   :  { %314 = vmatpush.xpose.msk.msra.mxu1 %vm211_vm1, %v195_v55 }
  0xd7   :  { %315 = vmatpush.xpose.msk.msra.mxu1 %vm211_vm1, %v194_v59 }
  0xdb   :  { %316 = vmatpush.xpose.msk.msra.mxu1 %vm211_vm1, %v193_v60 }
  0xdf   :  { %317 = vmatpush.xpose.msk.msra.mxu1 %vm211_vm1, %v192_v63 }
  0xe3   :  { %318 = vmatpush.xpose.msk.msra.mxu1 %vm211_vm1, %v191_v1 }
  0xe7   :  { %319 = vmatpush.xpose.msk.msra.mxu1 %vm211_vm1, %v190_v3 }
  0xeb   :  { %320 = vmatpush.xpose.msk.msra.mxu1 %vm211_vm1, %v189_v5 }
  0xef   :  { %321 = vmatpush.xpose.msk.msra.mxu1 %vm211_vm1, %v188_v6 }
  0xf2   :  { %322 = vmatmul.msk.f32.vlgmr.msra.gmra.mxu1 %vm211_vm1, %v204_v7 }
 0x16f   :  { %v280_v9 = vpop.f32.mrf.mxu1 }
 0x170   :  { %v281_v10 = vadd.f32 %v280_v9, %v209_v8 }
 0x172   :  { %283 = vst [vmem:[%s529_s5] sm:$0xff] %v281_v10 }
 0x173   :  { %288 = vsyncpa [#allocation3], 1 }
 0x174   :  { %289 = vsyncpa [#allocation5], 1 }

</bundles_post_ra>
